<compile_context>
chip_gen: v7x
topology: tpu7x:2x2x1
jax: 0.10.0
libtpu: 0.0.40
codegen_flags: <defaults>
</compile_context>

<pallas_src>
import functools

import jax
import jax.numpy as jnp
from jax.experimental import pallas as pl
from jax.experimental.pallas import tpu as pltpu

LANE = 128           # TPU lane width
SUBLANE = 8          # f32 sublane count
TILE_B_MAX = 1024    # batch rows per grid step (amortizes ~0.35us/step overhead)


def _round_up(x, m):
    return (x + m - 1) // m * m


def _bf16_vpu_supported():
    """bf16 VALU exists on v6e/v7x; v5e/v5p have no bf16 VPU."""
    try:
        kind = jax.devices()[0].device_kind.lower()
    except Exception:
        return True
    return "v5" not in kind


_BF16_ACT_DEFAULT = _bf16_vpu_supported()


def _hsw_noscale(x):
    # Hardswish without the 1/6 scale (folded into the consuming layer's weights):
    #   hardswish(x) @ W == (x * relu6(x + 3)) @ (W / 6)
    return x * jnp.clip(x + 3.0, 0.0, 6.0)


def actor_ppo_kernel(x_ref, w1_ref, w2_ref, w3_ref, w4_ref, b_ref, out_ref,
                     *, bf16_act):
    """One batch tile of the fused MLP.

    x_ref : (TILE_B, state_dim) f32
    wN_ref: bf16 weights, (in_p, out_p), lane-padded; w3/w4 carry the folded 1/6.
    b_ref : (8, BP) f32; rows 0..3 hold the (padded) biases of layers 1..4
    out   : (TILE_B, ACT_P) f32 (lane-dense padded action dim)
    """
    mid_p = w1_ref.shape[1]
    act_p = w4_ref.shape[1]
    act_dtype = jnp.bfloat16 if bf16_act else jnp.float32

    x = x_ref[...].astype(jnp.bfloat16)

    # Linear(state_dim, mid) + ReLU   (bf16 operands, f32 MXU accumulation)
    h = jnp.dot(x, w1_ref[...], preferred_element_type=jnp.float32)
    h = jnp.maximum((h + b_ref[0:1, :mid_p]).astype(act_dtype), 0.0)

    # Linear(mid, mid) + Hardswish (its 1/6 lives in w3)
    h = jnp.dot(h.astype(jnp.bfloat16), w2_ref[...],
                preferred_element_type=jnp.float32)
    h = _hsw_noscale((h + b_ref[1:2, :mid_p]).astype(act_dtype))

    # Linear(mid, mid) + Hardswish (its 1/6 lives in w4)
    h = jnp.dot(h.astype(jnp.bfloat16), w3_ref[...],
                preferred_element_type=jnp.float32)
    h = _hsw_noscale((h + b_ref[2:3, :mid_p]).astype(act_dtype))

    # Linear(mid, action)
    out = jnp.dot(h.astype(jnp.bfloat16), w4_ref[...],
                  preferred_element_type=jnp.float32)
    out_ref[...] = (out + b_ref[3:4, :act_p]).astype(out_ref.dtype)


def _pad2(a, rows, cols):
    return jnp.pad(a, ((0, rows - a.shape[0]), (0, cols - a.shape[1])))


def pack_params(params):
    """One-time packing: lane-pad, cast to bf16, fold Hardswish 1/6, pack biases."""
    (w1, b1), (w2, b2), (w3, b3), (w4, b4) = params
    state_dim, mid_dim = w1.shape
    action_dim = w4.shape[1]
    mid_p = _round_up(mid_dim, LANE)
    act_p = _round_up(action_dim, LANE)
    bias_p = max(mid_p, act_p)

    w1p = _pad2(w1, state_dim, mid_p).astype(jnp.bfloat16)
    w2p = _pad2(w2, mid_p, mid_p).astype(jnp.bfloat16)
    # Fold the Hardswish 1/6 of layers 2 and 3 into the weights that consume them.
    w3p = _pad2(w3 * (1.0 / 6.0), mid_p, mid_p).astype(jnp.bfloat16)
    w4p = _pad2(w4 * (1.0 / 6.0), mid_p, act_p).astype(jnp.bfloat16)

    # All four tiny biases in one (8, bias_p) operand -> a single resident DMA.
    bpack = jnp.zeros((SUBLANE, bias_p), jnp.float32)
    bpack = bpack.at[0, :mid_dim].set(b1.reshape(-1))
    bpack = bpack.at[1, :mid_dim].set(b2.reshape(-1))
    bpack = bpack.at[2, :mid_dim].set(b3.reshape(-1))
    bpack = bpack.at[3, :action_dim].set(b4.reshape(-1))

    return {"w1": w1p, "w2": w2p, "w3": w3p, "w4": w4p, "bias": bpack,
            "action_dim": action_dim}


def _choose_tile_b(B):
    """Large tiles (amortize grid-step overhead) but keep >=2 steps for big B
    so v7x's two TensorCores both get work via the 'parallel' batch axis."""
    half = _round_up(pl.cdiv(B, 2), SUBLANE)
    return max(SUBLANE, min(TILE_B_MAX, half))


def actor_ppo_forward(state, packed, *, bf16_act=None):
    """Fused ActorPPO.forward. state: (B, state_dim) f32 -> (B, action_dim) f32."""
    if bf16_act is None:
        bf16_act = _BF16_ACT_DEFAULT

    B, state_dim = state.shape
    w1p, w2p, w3p, w4p = packed["w1"], packed["w2"], packed["w3"], packed["w4"]
    bpack = packed["bias"]
    action_dim = packed["action_dim"]
    act_p = w4p.shape[1]

    tile_b = _choose_tile_b(B)
    grid = (pl.cdiv(B, tile_b),)   # last block may over-run; rows are independent

    const = lambda i: (0, 0)   # weights/biases: same block every step -> VMEM-resident
    out_padded = pl.pallas_call(
        functools.partial(actor_ppo_kernel, bf16_act=bf16_act),
        out_shape=jax.ShapeDtypeStruct((B, act_p), jnp.float32),
        grid=grid,
        in_specs=[
            pl.BlockSpec((tile_b, state_dim), lambda i: (i, 0)),
            pl.BlockSpec(w1p.shape, const),
            pl.BlockSpec(w2p.shape, const),
            pl.BlockSpec(w3p.shape, const),
            pl.BlockSpec(w4p.shape, const),
            pl.BlockSpec(bpack.shape, const),
        ],
        out_specs=pl.BlockSpec((tile_b, act_p), lambda i: (i, 0)),
        compiler_params=pltpu.CompilerParams(
            dimension_semantics=("parallel",),   # 2-TC sharding on v7x, no-op elsewhere
            vmem_limit_bytes=32 * 1024 * 1024,   # > v5e's 16 MiB default; fits v7x's 64 MiB
        ),
    )(state, w1p, w2p, w3p, w4p, bpack)

    return out_padded[:, :action_dim]


# ---------------------------------------------------------------------------
# Parameter init (matches the PyTorch module's shapes and layer_norm init)
# ---------------------------------------------------------------------------
def _orthogonal(key, shape, gain=1.0):
    """Deterministic orthogonal init (like torch.nn.init.orthogonal_)."""
    rows, cols = shape
    flat = jax.random.normal(key, (max(rows, cols), min(rows, cols)), jnp.float32)
    q, r = jnp.linalg.qr(flat)
    d = jnp.diagonal(r)
    q = q * jnp.where(d >= 0, 1.0, -1.0)   # avoid sign(0) zeroing a column
    if rows < cols:
        q = q.T
    return gain * q[:rows, :cols]


def make_params(key, state_dim, mid_dim, action_dim):
    """Weights stored as (in_features, out_features); biases as (1, out_features).
    Last layer: orthogonal init std=0.1, bias 1e-6 (layer_norm(self.net[-1], 0.1))."""
    ks = jax.random.split(key, 4)
    dims = [(state_dim, mid_dim), (mid_dim, mid_dim), (mid_dim, mid_dim),
            (mid_dim, action_dim)]
    params = []
    for i, (din, dout) in enumerate(dims):
        if i == 3:
            w = _orthogonal(ks[i], (dout, din), gain=0.1).T
            b = jnp.full((1, dout), 1e-6, jnp.float32)
        else:
            bound = 1.0 / jnp.sqrt(float(din))
            kw, kb = jax.random.split(ks[i])
            w = jax.random.uniform(kw, (din, dout), jnp.float32, -bound, bound)
            b = jax.random.uniform(kb, (1, dout), jnp.float32, -bound, bound)
        params.append((w, b))
    return params


# ---------------------------------------------------------------------------
# References
# ---------------------------------------------------------------------------
def _hardswish(x):
    return x * jnp.clip(x + 3.0, 0.0, 6.0) * (1.0 / 6.0)


def reference_forward_f32(state, params):
    (w1, b1), (w2, b2), (w3, b3), (w4, b4) = params
    h = jnp.maximum(state @ w1 + b1, 0.0)
    h = _hardswish(h @ w2 + b2)
    h = _hardswish(h @ w3 + b3)
    return h @ w4 + b4


def reference_forward_emulated(state, params, bf16_act):
    """Emulates the kernel's numerics: bf16 operands, f32 MXU accumulation,
    folded Hardswish 1/6, activations in bf16 (v6e/v7x) or f32 (v5e)."""
    act_dtype = jnp.bfloat16 if bf16_act else jnp.float32
    (w1, b1), (w2, b2), (w3, b3), (w4, b4) = params

    def mm(x, w):
        return jnp.dot(x.astype(jnp.bfloat16), w, preferred_element_type=jnp.float32)

    w1b = w1.astype(jnp.bfloat16)
    w2b = w2.astype(jnp.bfloat16)
    w3b = (w3 * (1.0 / 6.0)).astype(jnp.bfloat16)
    w4b = (w4 * (1.0 / 6.0)).astype(jnp.bfloat16)

    h = jnp.maximum((mm(state, w1b) + b1).astype(act_dtype), 0.0)
    h = _hsw_noscale((mm(h, w2b) + b2).astype(act_dtype))
    h = _hsw_noscale((mm(h, w3b) + b3).astype(act_dtype))
    return mm(h, w4b) + b4


if __name__ == "__main__":
    batch, state_dim, mid_dim, action_dim = 8, 24, 64, 6

    key = jax.random.PRNGKey(0)
    k_state, k_params, k_big, k_ragged = jax.random.split(key, 4)
    state = jax.random.normal(k_state, (batch, state_dim), jnp.float32)
    params = make_params(k_params, state_dim, mid_dim, action_dim)

    # One-time packing (lane pad, bf16 cast, 1/6 fold, bias pack); reused per call.
    packed = pack_params(params)
    bf16_act = _BF16_ACT_DEFAULT
    fwd = jax.jit(lambda s: actor_ppo_forward(s, packed, bf16_act=bf16_act))

    out = jax.block_until_ready(fwd(state))
    assert out.shape == (batch, action_dim)
    assert jnp.allclose(out, reference_forward_emulated(state, params, bf16_act),
                        atol=5e-3, rtol=2e-2), "mismatch vs emulated reference"
    assert jnp.allclose(out, reference_forward_f32(state, params),
                        atol=5e-2, rtol=5e-2), "mismatch vs f32 reference"

    # Multi-tile path: 2 grid steps, evenly divided batch.
    big_b = 384
    state_big = jax.random.normal(k_big, (big_b, state_dim), jnp.float32)
    out_big = jax.block_until_ready(fwd(state_big))
    assert out_big.shape == (big_b, action_dim)
    assert jnp.allclose(out_big,
                        reference_forward_emulated(state_big, params, bf16_act),
                        atol=5e-3, rtol=2e-2), "mismatch (big batch)"

    # Ragged batch: last block over-runs; clipped output writes keep results exact.
    rag_b = 100
    state_rag = jax.random.normal(k_ragged, (rag_b, state_dim), jnp.float32)
    out_rag = jax.block_until_ready(fwd(state_rag))
    assert out_rag.shape == (rag_b, action_dim)
    assert jnp.allclose(out_rag,
                        reference_forward_emulated(state_rag, params, bf16_act),
                        atol=5e-3, rtol=2e-2), "mismatch (ragged batch)"

    print("KERNEL_OK")
</pallas_src>

<mosaic_0001>
module attributes {stable_mosaic.version = 11 : i64} {
  func.func @actor_ppo_kernel(%arg0: i32, %arg1: memref<8x24xf32, #tpu.memory_space<vmem>>, %arg2: memref<24x128xbf16, #tpu.memory_space<vmem>>, %arg3: memref<128x128xbf16, #tpu.memory_space<vmem>>, %arg4: memref<128x128xbf16, #tpu.memory_space<vmem>>, %arg5: memref<128x128xbf16, #tpu.memory_space<vmem>>, %arg6: memref<8x128xf32, #tpu.memory_space<vmem>>, %arg7: memref<8x128xf32, #tpu.memory_space<vmem>>) attributes {dimension_semantics = [#tpu.dimension_semantics<parallel>], iteration_bounds = array<i64: 1>, scalar_prefetch = 0 : i64, scratch_operands = 0 : i64, tpu.core_type = #tpu.core_type<tc>, window_params = [{transform_indices = @transform_0, window_bounds = array<i64: 8, 24>}, {pipeline_mode = #tpu.pipeline_mode<synchronous>, transform_indices = @transform_1, window_bounds = array<i64: 24, 128>}, {pipeline_mode = #tpu.pipeline_mode<synchronous>, transform_indices = @transform_2, window_bounds = array<i64: 128, 128>}, {pipeline_mode = #tpu.pipeline_mode<synchronous>, transform_indices = @transform_3, window_bounds = array<i64: 128, 128>}, {pipeline_mode = #tpu.pipeline_mode<synchronous>, transform_indices = @transform_4, window_bounds = array<i64: 128, 128>}, {pipeline_mode = #tpu.pipeline_mode<synchronous>, transform_indices = @transform_5, window_bounds = array<i64: 8, 128>}, {transform_indices = @transform_6, window_bounds = array<i64: 8, 128>}]} {
    %c0 = arith.constant 0 : index
    %c0_0 = arith.constant 0 : index
    %0 = vector.load %arg1[%c0, %c0_0] : memref<8x24xf32, #tpu.memory_space<vmem>>, vector<8x24xf32>
    %1 = arith.truncf %0 : vector<8x24xf32> to vector<8x24xbf16>
    %c0_1 = arith.constant 0 : index
    %c0_2 = arith.constant 0 : index
    %2 = vector.load %arg2[%c0_1, %c0_2] : memref<24x128xbf16, #tpu.memory_space<vmem>>, vector<24x128xbf16>
    %cst = arith.constant dense<0.000000e+00> : vector<8x128xf32>
    %3 = tpu.matmul %1, %2, %cst {dimension_numbers = #tpu.dot_dimension_numbers<[1], [0], [0], [1], [0, 0, 1, 1], [], []>} : vector<8x24xbf16>, vector<24x128xbf16>, vector<8x128xf32> -> vector<8x128xf32>
    %c0_3 = arith.constant 0 : index
    %c0_4 = arith.constant 0 : index
    %4 = vector.load %arg6[%c0_3, %c0_4] : memref<8x128xf32, #tpu.memory_space<vmem>>, vector<1x128xf32>
    %5 = vector.broadcast %4 : vector<1x128xf32> to vector<8x128xf32>
    %6 = arith.addf %3, %5 : vector<8x128xf32>
    %7 = arith.truncf %6 : vector<8x128xf32> to vector<8x128xbf16>
    %cst_5 = arith.constant 0.000000e+00 : bf16
    %8 = vector.broadcast %cst_5 : bf16 to vector<8x128xbf16>
    %9 = arith.maximumf %7, %8 : vector<8x128xbf16>
    %c0_6 = arith.constant 0 : index
    %c0_7 = arith.constant 0 : index
    %10 = vector.load %arg3[%c0_6, %c0_7] : memref<128x128xbf16, #tpu.memory_space<vmem>>, vector<128x128xbf16>
    %cst_8 = arith.constant dense<0.000000e+00> : vector<8x128xf32>
    %11 = tpu.matmul %9, %10, %cst_8 {dimension_numbers = #tpu.dot_dimension_numbers<[1], [0], [0], [1], [0, 0, 1, 1], [], []>} : vector<8x128xbf16>, vector<128x128xbf16>, vector<8x128xf32> -> vector<8x128xf32>
    %c1 = arith.constant 1 : index
    %c0_9 = arith.constant 0 : index
    %12 = vector.load %arg6[%c1, %c0_9] : memref<8x128xf32, #tpu.memory_space<vmem>>, vector<1x128xf32>
    %13 = vector.broadcast %12 : vector<1x128xf32> to vector<8x128xf32>
    %14 = arith.addf %11, %13 : vector<8x128xf32>
    %15 = arith.truncf %14 : vector<8x128xf32> to vector<8x128xbf16>
    %cst_10 = arith.constant 3.000000e+00 : bf16
    %16 = vector.broadcast %cst_10 : bf16 to vector<8x128xbf16>
    %17 = arith.addf %15, %16 : vector<8x128xbf16>
    %cst_11 = arith.constant 0.000000e+00 : f32
    %cst_12 = arith.constant 6.000000e+00 : f32
    %18 = arith.truncf %cst_11 : f32 to bf16
    %19 = vector.broadcast %18 : bf16 to vector<8x128xbf16>
    %20 = arith.maximumf %19, %17 : vector<8x128xbf16>
    %21 = arith.truncf %cst_12 : f32 to bf16
    %22 = vector.broadcast %21 : bf16 to vector<8x128xbf16>
    %23 = arith.minimumf %22, %20 : vector<8x128xbf16>
    %24 = arith.mulf %15, %23 : vector<8x128xbf16>
    %c0_13 = arith.constant 0 : index
    %c0_14 = arith.constant 0 : index
    %25 = vector.load %arg4[%c0_13, %c0_14] : memref<128x128xbf16, #tpu.memory_space<vmem>>, vector<128x128xbf16>
    %cst_15 = arith.constant dense<0.000000e+00> : vector<8x128xf32>
    %26 = tpu.matmul %24, %25, %cst_15 {dimension_numbers = #tpu.dot_dimension_numbers<[1], [0], [0], [1], [0, 0, 1, 1], [], []>} : vector<8x128xbf16>, vector<128x128xbf16>, vector<8x128xf32> -> vector<8x128xf32>
    %c2 = arith.constant 2 : index
    %c0_16 = arith.constant 0 : index
    %27 = vector.load %arg6[%c2, %c0_16] : memref<8x128xf32, #tpu.memory_space<vmem>>, vector<1x128xf32>
    %28 = vector.broadcast %27 : vector<1x128xf32> to vector<8x128xf32>
    %29 = arith.addf %26, %28 : vector<8x128xf32>
    %30 = arith.truncf %29 : vector<8x128xf32> to vector<8x128xbf16>
    %cst_17 = arith.constant 3.000000e+00 : bf16
    %31 = vector.broadcast %cst_17 : bf16 to vector<8x128xbf16>
    %32 = arith.addf %30, %31 : vector<8x128xbf16>
    %cst_18 = arith.constant 0.000000e+00 : f32
    %cst_19 = arith.constant 6.000000e+00 : f32
    %33 = arith.truncf %cst_18 : f32 to bf16
    %34 = vector.broadcast %33 : bf16 to vector<8x128xbf16>
    %35 = arith.maximumf %34, %32 : vector<8x128xbf16>
    %36 = arith.truncf %cst_19 : f32 to bf16
    %37 = vector.broadcast %36 : bf16 to vector<8x128xbf16>
    %38 = arith.minimumf %37, %35 : vector<8x128xbf16>
    %39 = arith.mulf %30, %38 : vector<8x128xbf16>
    %c0_20 = arith.constant 0 : index
    %c0_21 = arith.constant 0 : index
    %40 = vector.load %arg5[%c0_20, %c0_21] : memref<128x128xbf16, #tpu.memory_space<vmem>>, vector<128x128xbf16>
    %cst_22 = arith.constant dense<0.000000e+00> : vector<8x128xf32>
    %41 = tpu.matmul %39, %40, %cst_22 {dimension_numbers = #tpu.dot_dimension_numbers<[1], [0], [0], [1], [0, 0, 1, 1], [], []>} : vector<8x128xbf16>, vector<128x128xbf16>, vector<8x128xf32> -> vector<8x128xf32>
    %c3 = arith.constant 3 : index
    %c0_23 = arith.constant 0 : index
    %42 = vector.load %arg6[%c3, %c0_23] : memref<8x128xf32, #tpu.memory_space<vmem>>, vector<1x128xf32>
    %43 = vector.broadcast %42 : vector<1x128xf32> to vector<8x128xf32>
    %44 = arith.addf %41, %43 : vector<8x128xf32>
    %c0_24 = arith.constant 0 : index
    %c0_25 = arith.constant 0 : index
    %45 = vector.load %arg7[%c0_24, %c0_25] : memref<8x128xf32, #tpu.memory_space<vmem>>, vector<8x128xf32>
    tpu.vector_store %arg7[%c0_24, %c0_25], %44 {strides = array<i32>} : memref<8x128xf32, #tpu.memory_space<vmem>>, vector<8x128xf32>,
    return
  }
  func.func @transform_0(%arg0: i32) -> (i32, i32) {
    %c0_i32 = arith.constant 0 : i32
    %c0_i32_0 = arith.constant 0 : i32
    return %arg0, %c0_i32 : i32, i32
  }
  func.func @transform_1(%arg0: i32) -> (i32, i32) {
    %c0_i32 = arith.constant 0 : i32
    %c0_i32_0 = arith.constant 0 : i32
    %c0_i32_1 = arith.constant 0 : i32
    return %c0_i32, %c0_i32_0 : i32, i32
  }
  func.func @transform_2(%arg0: i32) -> (i32, i32) {
    %c0_i32 = arith.constant 0 : i32
    %c0_i32_0 = arith.constant 0 : i32
    %c0_i32_1 = arith.constant 0 : i32
    return %c0_i32, %c0_i32_0 : i32, i32
  }
  func.func @transform_3(%arg0: i32) -> (i32, i32) {
    %c0_i32 = arith.constant 0 : i32
    %c0_i32_0 = arith.constant 0 : i32
    %c0_i32_1 = arith.constant 0 : i32
    return %c0_i32, %c0_i32_0 : i32, i32
  }
  func.func @transform_4(%arg0: i32) -> (i32, i32) {
    %c0_i32 = arith.constant 0 : i32
    %c0_i32_0 = arith.constant 0 : i32
    %c0_i32_1 = arith.constant 0 : i32
    return %c0_i32, %c0_i32_0 : i32, i32
  }
  func.func @transform_5(%arg0: i32) -> (i32, i32) {
    %c0_i32 = arith.constant 0 : i32
    %c0_i32_0 = arith.constant 0 : i32
    %c0_i32_1 = arith.constant 0 : i32
    return %c0_i32, %c0_i32_0 : i32, i32
  }
  func.func @transform_6(%arg0: i32) -> (i32, i32) {
    %c0_i32 = arith.constant 0 : i32
    %c0_i32_0 = arith.constant 0 : i32
    return %arg0, %c0_i32 : i32, i32
  }
}

</mosaic_0001>

<bundles_post_ra>
// kernel: _lambda_.1
= control target key start
LH: loop header
LB: loop body
LE: loop exit
PB: predicated region body
PF: predicated region fallthrough
CT: control target
= control target key end

     0   :  { %11 = vsyncpa [#allocation3], 0  ;;  %s990_s0 = inlined_call_operand.hbm [shape: f32[8,24], index: 0, kind: input, shape index: {}]   ;;  %s991_s1 = inlined_call_operand.vmem [shape: bf16[24,128], index: 1, kind: input, shape index: {}]   ;;  %s992_s2 = inlined_call_operand.hbm [shape: bf16[128,128], index: 2, kind: input, shape index: {}]   ;;  %s993_s3 = inlined_call_operand.hbm [shape: bf16[128,128], index: 3, kind: input, shape index: {}]   ;;  %s994_s4 = inlined_call_operand.hbm [shape: bf16[128,128], index: 4, kind: input, shape index: {}]   ;;  %s995_s5 = inlined_call_operand.hbm [shape: f32[8,128], index: 5, kind: input, shape index: {}]   ;;  %s996_s6 = inlined_call_operand.hbm [shape: f32[8,128], index: 6, kind: output, shape index: {}]  }
   0x1   :  { %12 = vsyncpa [#allocation6], 0 }
   0x2   :  { %13 = vsyncpa [#allocation9], 0 }
   0x3   :  { %14 = vsyncpa [#allocation4], 0  ;;  %s822_s21 = smov [#allocation5]   ;;  %s682_s25 = scalar_lea.hbm %s992_s2, 1024 }
   0x4   :  { %s32_s22 = sshll.u32 %s822_s21, 4  ;;  %p683_p0 = scmp.ne.s32.totalorder %s992_s2, %s682_s25  ;;  %s33_s22 = int_to_ptr.vmem [resolvable:$true] %s32_s22 }
   0x5   :  { %p686_p1 = scmp.lt.u32.totalorder %s682_s25, %s992_s2 }
   0x7   :  { %p688_p2 = pnand %p686_p1, %p683_p0 }
   0x9   :  { %691 = shalt.err (!%p688_p2)
}
   0xa   :  { %s692_s30 = scalar_lea.vmem %s33_s22, 1024  ;;  %p697_p4 = scmp.lt.s32.totalorder %s33_s22, %s33_s22 }
   0xb   :  { %p693_p3 = scmp.ne.s32.totalorder %s33_s22, %s692_s30  ;;  %p698_p5 = scmp.lt.s32.totalorder %s692_s30, %s692_s30 }
   0xd   :  { %p699_p6 = por %p698_p5, %p697_p4 }
   0xf   :  { %p700_p7 = pnand %p699_p6, %p693_p3 }
  0x11   :  { %703 = shalt.err (!%p700_p7)
}
  0x12   :  { %s823_s7 = smov 64   ;;  %s824_s8 = smov 4  }
  0x13   :  { %38 = dma.hbm_to_vmem [thread:$0]  %s992_s2, 1024, %s33_s22, [#allocation6], %s823_s7, %s823_s7, %s824_s8  }
  0x14   :  { %s825_s11 = smov [#allocation8]   ;;  %s826_s13 = smov [#allocation2]  }
  0x15   :  { %s56_s12 = sshll.u32 %s825_s11, 4  ;;  %s21_s14 = sshll.u32 %s826_s13, 4  ;;  %s57_s12 = int_to_ptr.vmem [resolvable:$true] %s56_s12  ;;  %s22_s14 = int_to_ptr.vmem [resolvable:$true] %s21_s14 }
  0x16   :  { %s704_s17 = scalar_lea.hbm %s994_s4, 1024 }
  0x17   :  { %p705_p8 = scmp.ne.s32.totalorder %s994_s4, %s704_s17  ;;  %p708_p9 = scmp.lt.u32.totalorder %s704_s17, %s994_s4 }
  0x19   :  { %p710_p10 = pnand %p708_p9, %p705_p8 }
  0x1b   :  { %713 = shalt.err (!%p710_p10)
}
  0x1c   :  { %s714_s2 = scalar_lea.vmem %s57_s12, 1024  ;;  %p719_p12 = scmp.lt.s32.totalorder %s57_s12, %s57_s12 }
  0x1d   :  { %p715_p11 = scmp.ne.s32.totalorder %s57_s12, %s714_s2  ;;  %p720_p13 = scmp.lt.s32.totalorder %s714_s2, %s714_s2 }
  0x1f   :  { %p721_p0 = por %p720_p13, %p719_p12 }
  0x21   :  { %p722_p1 = pnand %p721_p0, %p715_p11 }
  0x23   :  { %725 = shalt.err (!%p722_p1)
}
  0x24   :  { %62 = dma.hbm_to_vmem [thread:$0]  %s994_s4, 1024, %s57_s12, [#allocation9], %s823_s7, %s823_s7, %s824_s8  }
  0x25   :  { %s726_s26 = scalar_lea.hbm %s990_s0, 128 }
  0x26   :  { %p727_p2 = scmp.ne.s32.totalorder %s990_s0, %s726_s26  ;;  %p730_p3 = scmp.lt.u32.totalorder %s726_s26, %s990_s0 }
  0x28   :  { %p732_p4 = pnand %p730_p3, %p727_p2 }
  0x2a   :  { %735 = shalt.err (!%p732_p4)
}
  0x2b   :  { %s736_s9 = scalar_lea.vmem %s22_s14, 128  ;;  %p741_p6 = scmp.lt.s32.totalorder %s22_s14, %s22_s14 }
  0x2c   :  { %p737_p5 = scmp.ne.s32.totalorder %s22_s14, %s736_s9  ;;  %p742_p7 = scmp.lt.s32.totalorder %s736_s9, %s736_s9 }
  0x2e   :  { %p743_p8 = por %p742_p7, %p741_p6 }
  0x30   :  { %p744_p9 = pnand %p743_p8, %p737_p5 }
  0x32   :  { %747 = shalt.err (!%p744_p9)
}
  0x33   :  { %24 = dma.hbm_to_vmem [thread:$0]  %s990_s0, 128, %s22_s14, [#allocation3]  }
  0x34   :  { %s827_s11 = smov [#allocation7]   ;;  %s828_s13 = smov [#allocation10]  }
  0x35   :  { %s44_s12 = sshll.u32 %s827_s11, 4  ;;  %s69_s15 = sshll.u32 %s828_s13, 4  ;;  %s45_s12 = int_to_ptr.vmem [resolvable:$true] %s44_s12  ;;  %s70_s15 = int_to_ptr.vmem [resolvable:$true] %s69_s15 }
  0x36   :  { %s748_s18 = scalar_lea.hbm %s993_s3, 1024 }
  0x37   :  { %p749_p10 = scmp.ne.s32.totalorder %s993_s3, %s748_s18  ;;  %p752_p11 = scmp.lt.u32.totalorder %s748_s18, %s993_s3 }
  0x39   :  { %p754_p12 = pnand %p752_p11, %p749_p10 }
  0x3b   :  { %757 = shalt.err (!%p754_p12)
}
  0x3c   :  { %s758_s0 = scalar_lea.vmem %s45_s12, 1024  ;;  %p763_p0 = scmp.lt.s32.totalorder %s45_s12, %s45_s12 }
  0x3d   :  { %p759_p13 = scmp.ne.s32.totalorder %s45_s12, %s758_s0  ;;  %p764_p1 = scmp.lt.s32.totalorder %s758_s0, %s758_s0 }
  0x3f   :  { %p765_p2 = por %p764_p1, %p763_p0 }
  0x41   :  { %p766_p3 = pnand %p765_p2, %p759_p13 }
  0x43   :  { %769 = shalt.err (!%p766_p3)
}
  0x44   :  { %50 = dma.hbm_to_vmem [thread:$0]  %s993_s3, 1024, %s45_s12, [#allocation6], %s823_s7, %s823_s7, %s824_s8  }
  0x45   :  { %s770_s25 = scalar_lea.hbm %s995_s5, 128 }
  0x46   :  { %p771_p4 = scmp.ne.s32.totalorder %s995_s5, %s770_s25  ;;  %p774_p5 = scmp.lt.u32.totalorder %s770_s25, %s995_s5 }
  0x48   :  { %p776_p6 = pnand %p774_p5, %p771_p4 }
  0x4a   :  { %779 = shalt.err (!%p776_p6)
}
  0x4b   :  { %s780_s30 = scalar_lea.vmem %s70_s15, 128  ;;  %p785_p8 = scmp.lt.s32.totalorder %s70_s15, %s70_s15 }
  0x4c   :  { %p781_p7 = scmp.ne.s32.totalorder %s70_s15, %s780_s30  ;;  %p786_p9 = scmp.lt.s32.totalorder %s780_s30, %s780_s30 }
  0x4e   :  { %p787_p10 = por %p786_p9, %p785_p8 }
  0x50   :  { %p788_p11 = pnand %p787_p10, %p781_p7 }
  0x52   :  { %791 = shalt.err (!%p788_p11)
}
  0x53   :  { %72 = dma.hbm_to_vmem [thread:$0]  %s995_s5, 128, %s70_s15, [#allocation9]  }
  0x54   :  { %814 = dma.done.wait [#allocation3], 128  }
  0x55   :  { %815 = vsyncadd [#allocation3], 4294967168 }
  0x56   :  { %816 = dma.done.wait [#allocation6], 2048  }
  0x57   :  { %817 = vsyncadd [#allocation6], 4294965248 }
  0x58   :  { %818 = dma.done.wait [#allocation9], 1152  }
  0x59   :  { %819 = vsyncadd [#allocation9], 4294966144  ;;  %v829_v0 = vmov 0.0   ;;  %vm830_vm0 = vmmov 0   ;;  %v656_v1 = vld [vmem:[%s991_s1] sm:$0xff]   ;;  %vm114_vm1 = vcmask 1043456  }
  0x5a   :  { %576 = vmatprep.subr.bf16.mxu0 %v829_v0  ;;  %580 = vmatprep.mubr.msk.bf16.mxu0 %vm830_vm0, %v829_v0  ;;  %v657_v2 = vld [vmem:[%s991_s1 + $0x8] ss:$0 sps:$4 sm:$0xff]   ;;  %v91_v3 = vld [vmem:[#allocation2] sm:$0xff]  ;;  %v659_v6 = vld [vmem:[#allocation5 + $0x8] sm:$0xff]   ;;  %vm110_vm2 = vcmask 195584   ;;  %v831_v26 = vmov 0  }
  0x5b   :  { %584 = vmatprep.subr.bf16.mxu1 %v829_v0  ;;  %600 = vmatprep.mubr.msk.bf16.mxu1 %vm830_vm0, %v829_v0  ;;  %v658_v4 = vld [vmem:[#allocation5] sm:$0xff]   ;;  %v116_v5 = vsel %vm114_vm1, %v657_v2, 0  ;;  %v92_v7 = vpack.c.bf16 %v91_v3, %v91_v3  ;;  %v660_v8 = vld [vmem:[#allocation5 + $0x10] sm:$0xff]   ;;  %v661_v9 = vld [vmem:[#allocation5 + $0x18] sm:$0xff]   ;;  %v832_v45 = vmov 1086341312  }
  0x5c   :  { %577 = vmatpush3.bf16.msra.mxu0 %v656_v1  ;;  %585 = vmatpush3.bf16.msra.mxu1 %v658_v4  ;;  %v662_v10 = vld [vmem:[#allocation5 + $0x20] sm:$0xff]   ;;  %v663_v11 = vld [vmem:[#allocation5 + $0x28] sm:$0xff]   ;;  %v664_v12 = vld [vmem:[#allocation5 + $0x30] sm:$0xff]   ;;  %s833_s1 = smov [#allocation11]  }
  0x5d   :  { %578 = vmatprep.subr.bf16.mxu0 %v829_v0  ;;  %586 = vmatprep.subr.bf16.mxu1 %v829_v0  ;;  %v665_v13 = vld [vmem:[#allocation5 + $0x38] sm:$0xff]   ;;  %v666_v14 = vld [vmem:[#allocation7] sm:$0xff]   ;;  %v667_v15 = vld [vmem:[#allocation7 + $0x8] sm:$0xff]   ;;  %s504_s10 = sshll.u32 %s833_s1, 4  ;;  %s505_s10 = int_to_ptr.vmem [resolvable:$true] %s504_s10 }
  0x5e   :  { %v668_v16 = vld [vmem:[#allocation7 + $0x10] sm:$0xff]   ;;  %v669_v17 = vld [vmem:[#allocation7 + $0x18] sm:$0xff]   ;;  %v670_v18 = vld [vmem:[#allocation7 + $0x20] sm:$0xff]   ;;  %s792_s11 = scalar_lea.vmem %s505_s10, 128  ;;  %p797_p13 = scmp.lt.s32.totalorder %s505_s10, %s505_s10 }
  0x5f   :  { %v515_v19 = vld [vmem:[#allocation10] ss:$0 sm:$0xff]  ;;  %v671_v28 = vld [vmem:[#allocation7 + $0x28] sm:$0xff]   ;;  %v672_v29 = vld [vmem:[#allocation7 + $0x30] sm:$0xff]   ;;  %p793_p12 = scmp.ne.s32.totalorder %s505_s10, %s792_s11  ;;  %p798_p0 = scmp.lt.s32.totalorder %s792_s11, %s792_s11 }
  0x60   :  { %579 = vmatpush3.bf16.msra.mxu0 %v116_v5  ;;  %587 = vmatpush3.bf16.msra.mxu1 %v659_v6  ;;  %v673_v30 = vld [vmem:[#allocation7 + $0x38] sm:$0xff]   ;;  %v674_v31 = vld [vmem:[#allocation8] sm:$0xff]   ;;  %v675_v32 = vld [vmem:[#allocation8 + $0x8] sm:$0xff]  }
  0x61   :  { %604 = vmatprep.subr.bf16.mxu0 %v829_v0  ;;  %588 = vmatprep.subr.bf16.mxu1 %v829_v0  ;;  %v676_v33 = vld [vmem:[#allocation8 + $0x10] sm:$0xff]   ;;  %v677_v34 = vld [vmem:[#allocation8 + $0x18] sm:$0xff]   ;;  %v678_v35 = vld [vmem:[#allocation8 + $0x20] sm:$0xff]   ;;  %p799_p1 = por %p798_p0, %p797_p13 }
  0x62   :  { %v519_v36 = vld [vmem:[#allocation10 + $0x1] ss:$0 sm:$0xff]  ;;  %v679_v48 = vld [vmem:[#allocation8 + $0x28] sm:$0xff]   ;;  %v680_v49 = vld [vmem:[#allocation8 + $0x30] sm:$0xff]  }
  0x63   :  { %581 = vmatmul.mubr.msk.bf16.vlgmr.msra.gmra.mrb[0].mxu0 %vm110_vm2, %v92_v7  ;;  %v681_v50 = vld [vmem:[#allocation8 + $0x38] sm:$0xff]   ;;  %v528_v51 = vld [vmem:[#allocation10 + $0x2] ss:$0 sm:$0xff]  ;;  %v537_v62 = vld [vmem:[#allocation10 + $0x3] ss:$0 sm:$0xff]  ;;  %p800_p2 = pnand %p799_p1, %p793_p12 }
  0x64   :  { %620 = vmatprep.mubr.msk.bf16.mxu0 %vm830_vm0, %v829_v0  ;;  %589 = vmatpush3.bf16.msra.mxu1 %v660_v8 }
  0x65   :  { %590 = vmatprep.subr.bf16.mxu1 %v829_v0  ;;  %605 = vmatpush3.bf16.msra.mxu0 %v666_v14 }
  0x66   :  { %606 = vmatprep.subr.bf16.mxu0 %v829_v0 }
  0x68   :  { %591 = vmatpush3.bf16.msra.mxu1 %v661_v9 }
  0x69   :  { %592 = vmatprep.subr.bf16.mxu1 %v829_v0  ;;  %607 = vmatpush3.bf16.msra.mxu0 %v667_v15 }
  0x6a   :  { %608 = vmatprep.subr.bf16.mxu0 %v829_v0 }
  0x6c   :  { %593 = vmatpush3.bf16.msra.mxu1 %v662_v10 }
  0x6d   :  { %594 = vmatprep.subr.bf16.mxu1 %v829_v0  ;;  %609 = vmatpush3.bf16.msra.mxu0 %v668_v16 }
  0x6e   :  { %610 = vmatprep.subr.bf16.mxu0 %v829_v0 }
  0x70   :  { %595 = vmatpush3.bf16.msra.mxu1 %v663_v11 }
  0x71   :  { %596 = vmatprep.subr.bf16.mxu1 %v829_v0  ;;  %611 = vmatpush3.bf16.msra.mxu0 %v669_v17 }
  0x72   :  { %612 = vmatprep.subr.bf16.mxu0 %v829_v0 }
  0x74   :  { %597 = vmatpush3.bf16.msra.mxu1 %v664_v12 }
  0x75   :  { %598 = vmatprep.subr.bf16.mxu1 %v829_v0  ;;  %613 = vmatpush3.bf16.msra.mxu0 %v670_v18 }
  0x76   :  { %614 = vmatprep.subr.bf16.mxu0 %v829_v0 }
  0x78   :  { %599 = vmatpush3.bf16.msra.mxu1 %v665_v13 }
  0x79   :  { %624 = vmatprep.subr.bf16.mxu1 %v829_v0  ;;  %615 = vmatpush3.bf16.msra.mxu0 %v671_v28 }
  0x7a   :  { %616 = vmatprep.subr.bf16.mxu0 %v829_v0 }
  0x7d   :  { %617 = vmatpush3.bf16.msra.mxu0 %v672_v29 }
  0x7e   :  { %618 = vmatprep.subr.bf16.mxu0 %v829_v0 }
  0x81   :  { %619 = vmatpush3.bf16.msra.mxu0 %v673_v30 }
 0x136   :  { %v152_v20 = vpop.f32.mrb[0].mxu0 }
 0x137   :  { %v153_v21 = vadd.f32 %v515_v19, %v152_v20  ;;  %v582_v22 = vpop.f32.mrb[1].mxu0 }
 0x138   :  { %v155_v23 = vpop.f32.mrb[2].mxu0 }
 0x139   :  { %v158_v24 = vpack.c.bf16 %v153_v21, %v153_v21  ;;  %v583_v25 = vpop.f32.mrb[3].mxu0 }
 0x13b   :  { %v159_v27 = vmax.bf16 %v831_v26, %v158_v24 }
 0x13d   :  { %601 = vmatmul.mubr.bf16.vlgmr.msra.gmra.mrb[0].mxu1 %v159_v27 }
 0x13e   :  { %640 = vmatprep.mubr.msk.bf16.mxu1 %vm830_vm0, %v829_v0  ;;  %625 = vmatpush3.bf16.msra.mxu1 %v674_v31 }
 0x13f   :  { %626 = vmatprep.subr.bf16.mxu1 %v829_v0 }
 0x142   :  { %627 = vmatpush3.bf16.msra.mxu1 %v675_v32 }
 0x143   :  { %628 = vmatprep.subr.bf16.mxu1 %v829_v0 }
 0x146   :  { %629 = vmatpush3.bf16.msra.mxu1 %v676_v33 }
 0x147   :  { %630 = vmatprep.subr.bf16.mxu1 %v829_v0 }
 0x14a   :  { %631 = vmatpush3.bf16.msra.mxu1 %v677_v34 }
 0x14b   :  { %632 = vmatprep.subr.bf16.mxu1 %v829_v0 }
 0x14e   :  { %633 = vmatpush3.bf16.msra.mxu1 %v678_v35 }
 0x14f   :  { %634 = vmatprep.subr.bf16.mxu1 %v829_v0 }
 0x152   :  { %635 = vmatpush3.bf16.msra.mxu1 %v679_v48 }
 0x153   :  { %636 = vmatprep.subr.bf16.mxu1 %v829_v0 }
 0x156   :  { %637 = vmatpush3.bf16.msra.mxu1 %v680_v49 }
 0x157   :  { %638 = vmatprep.subr.bf16.mxu1 %v829_v0 }
 0x15a   :  { %639 = vmatpush3.bf16.msra.mxu1 %v681_v50 }
 0x210   :  { %v263_v37 = vpop.f32.mrb[0].mxu1 }
 0x211   :  { %v264_v38 = vadd.f32 %v519_v36, %v263_v37  ;;  %v602_v39 = vpop.f32.mrb[1].mxu1 }
 0x212   :  { %v266_v40 = vpop.f32.mrb[2].mxu1 }
 0x213   :  { %v269_v41 = vpack.c.bf16 %v264_v38, %v264_v38  ;;  %v603_v42 = vpop.f32.mrb[3].mxu1 }
 0x215   :  { %v270_v43 = vadd.bf16 1077952576, %v269_v41 }
 0x217   :  { %v271_v44 = vmax.bf16 %v831_v26, %v270_v43 }
 0x219   :  { %v272_v46 = vmin.bf16 %v832_v45, %v271_v44 }
 0x21b   :  { %v273_v47 = vmul.bf16 %v272_v46, %v269_v41 }
 0x21d   :  { %621 = vmatmul.mubr.bf16.vlgmr.msra.gmra.mrb[4].mxu0 %v273_v47 }
 0x2f0   :  { %v377_v52 = vpop.f32.mrb[4].mxu0 }
 0x2f1   :  { %v378_v53 = vadd.f32 %v528_v51, %v377_v52  ;;  %v622_v54 = vpop.f32.mrb[5].mxu0 }
 0x2f2   :  { %v380_v55 = vpop.f32.mrb[6].mxu0 }
 0x2f3   :  { %v383_v56 = vpack.c.bf16 %v378_v53, %v378_v53  ;;  %v623_v57 = vpop.f32.mrb[7].mxu0 }
 0x2f5   :  { %v384_v58 = vadd.bf16 1077952576, %v383_v56 }
 0x2f7   :  { %v385_v59 = vmax.bf16 %v831_v26, %v384_v58 }
 0x2f9   :  { %v386_v60 = vmin.bf16 %v832_v45, %v385_v59 }
 0x2fb   :  { %v387_v61 = vmul.bf16 %v386_v60, %v383_v56 }
 0x2fd   :  { %641 = vmatmul.mubr.bf16.vlgmr.msra.gmra.mrb[4].mxu1 %v387_v61 }
 0x3d0   :  { %v491_v63 = vpop.f32.mrb[4].mxu1 }
 0x3d1   :  { %v492_v1 = vadd.f32 %v537_v62, %v491_v63  ;;  %v642_v0 = vpop.f32.mrb[5].mxu1 }
 0x3d2   :  { %v494_v2 = vpop.f32.mrb[6].mxu1 }
 0x3d3   :  { %497 = vst [vmem:[#allocation11] sm:$0xff] %v492_v1  ;;  %v643_v3 = vpop.f32.mrb[7].mxu1 }
 0x3d4   :  { %803 = shalt.err (!%p800_p2)
}
 0x3d5   :  { %s804_s15 = scalar_lea.hbm %s996_s6, 128 }
 0x3d6   :  { %p805_p3 = scmp.ne.s32.totalorder %s996_s6, %s804_s15  ;;  %p808_p4 = scmp.lt.u32.totalorder %s804_s15, %s996_s6 }
 0x3d8   :  { %p810_p5 = pnand %p808_p4, %p805_p3 }
 0x3da   :  { %813 = shalt.err (!%p810_p5)
}
 0x3db   :  { %507 = dma.vmem_to_hbm [thread:$0]  %s505_s10, 128, %s996_s6, [#allocation4]  }
 0x3dc   :  { %820 = dma.done.wait [#allocation4], 128  }
 0x3dd   :  { %821 = vsyncadd [#allocation4], 4294967168 }
 0x3de   :  { %511 = vsyncpa [#allocation3], 1 }
 0x3df   :  { %512 = vsyncpa [#allocation6], 1 }
 0x3e0   :  { %513 = vsyncpa [#allocation9], 1 }
 0x3e1   :  { %514 = vsyncpa [#allocation4], 1 }

</bundles_post_ra>
